<compile_context>
chip_gen: v6e
topology: v6e:2x2x1
jax: 0.10.0
libtpu: 0.0.40
codegen_flags: <defaults>
</compile_context>

<pallas_src>
import jax
import jax.numpy as jnp
import numpy as np
from jax.experimental import pallas as pl
from jax.experimental.pallas import tpu as pltpu


def lammps_bam_kernel(node_ref, w_hp_ref, w_hz_ref, b_ref, w_out_ref,
                      w_ps_ref, c_ref, slab_ref, gsum_ref):
    T = node_ref.shape[1]                     # TILE_N (lane = node)
    H = w_out_ref.shape[1]                    # hidden size
    Z = w_hz_ref.shape[1]                     # number of species
    G = gsum_ref.shape[0]                     # number of graphs

    nodes = node_ref[...]                     # (6, T) f32  -- single DMA'd slab
    pos = nodes[0:3, :]                       # (3, T)
    spec = nodes[3:4, :].astype(jnp.int32)    # (1, T) species id (float-coded)
    batch = nodes[4:5, :].astype(jnp.int32)   # (1, T) graph id   (float-coded)
    mask = nodes[5:6, :]                      # (1, T) local/ghost mask

    # species one-hot built in-kernel (VPU compare, no HBM traffic)
    zids = jax.lax.broadcasted_iota(jnp.int32, (Z, T), 0)
    onehot = (zids == spec).astype(jnp.float32)                  # (Z, T)

    # hidden pre-activation + atomic reference energy (row H), two MXU passes
    z = jnp.dot(w_hp_ref[...], pos, preferred_element_type=jnp.float32)      # (H+1, T)
    z = z + jnp.dot(w_hz_ref[...], onehot, preferred_element_type=jnp.float32)
    z = z + b_ref[...]                                            # bias row H is 0

    a = jnp.tanh(z[:H, :])                                        # (H, T)  EUP
    e0 = z[H:H + 1, :]                                            # (1, T)

    # node readout as an MXU matmul (instead of VPU mul + sublane reduce)
    node_e = e0 + jnp.dot(w_out_ref[...], a,
                          preferred_element_type=jnp.float32)     # (1, T)
    slab_ref[0:1, :] = node_e                                     # direct slice store

    # forces = -dE/dpos with w_out pre-folded into w_ps: F = c + w_ps @ a^2
    forces = c_ref[...] + jnp.dot(w_ps_ref[...], a * a,
                                  preferred_element_type=jnp.float32)  # (3, T)
    slab_ref[1:4, :] = forces

    # per-graph masked node-energy, lane-reduced in kernel (XLU has slack)
    gids = jax.lax.broadcasted_iota(jnp.int32, (G, T), 0)
    sel = (gids == batch).astype(jnp.float32)                     # (G, T)
    gsum = jnp.sum(sel * (node_e * mask), axis=1, keepdims=True)  # (G, 1)
    gsum_ref[...] = jnp.broadcast_to(gsum, (G, 128))


def lammps_bam_forward(params, data, local_or_ghost, tile_n_max=16384):
    """JAX glue mirroring LAMMPS_BAM.forward (hot path inside the Pallas kernel)."""
    pos = data['positions'].astype(jnp.float32)               # (N, 3)
    species = data['node_species'].astype(jnp.int32)          # (N,)
    batch = data['batch'].astype(jnp.int32)                   # (N,)
    num_graphs = int(data['ptr'].shape[0]) - 1

    n_nodes = pos.shape[0]
    n_species, hidden = params['w_emb'].shape
    head_idx = int(params['head'])                             # buffer `head`

    # --- fused / head-selected weights (built once in the wrapper) ---
    w_pos = params['w_pos'].astype(jnp.float32)                # (3, H)
    w_emb = params['w_emb'].astype(jnp.float32)                # (Z, H)
    ae = params['atomic_energies'].astype(jnp.float32)         # (Z, 1)
    w_out_row = params['w_readout'][:, head_idx].astype(jnp.float32).reshape(1, hidden)

    w_hp = jnp.concatenate([w_pos.T, jnp.zeros((1, 3), jnp.float32)], axis=0)  # (H+1, 3)
    w_hz = jnp.concatenate([w_emb.T, ae.T], axis=0)                            # (H+1, Z)
    b_aug = jnp.concatenate([params['b'].astype(jnp.float32).reshape(hidden, 1),
                             jnp.zeros((1, 1), jnp.float32)], axis=0)          # (H+1, 1)
    w_ps = w_pos * w_out_row                                                   # (3, H)
    c = -jnp.sum(w_ps, axis=1, keepdims=True)                                  # (3, 1)

    # --- tile / pad the node dimension (lane = node layout) ---
    lane = 128
    n_ceil = ((max(n_nodes, 1) + lane - 1) // lane) * lane
    # aim for >= ~8 grid steps on large N so the "parallel" axis can shard
    # across v7x's 2 TensorCores while still amortizing per-step overhead
    target = (((max(n_nodes, 1) + 7) // 8 + lane - 1) // lane) * lane
    tile_n = max(lane, min(tile_n_max, target, n_ceil))
    n_pad = ((n_nodes + tile_n - 1) // tile_n) * tile_n
    num_tiles = n_pad // tile_n
    pad = n_pad - n_nodes

    # single lane-dense input slab: pos rows 0-2, species 3, batch 4, mask 5
    node_slab = jnp.concatenate([
        jnp.pad(pos, ((0, pad), (0, 0))).T,                                    # (3, N_pad)
        jnp.pad(species.astype(jnp.float32), (0, pad)).reshape(1, n_pad),
        jnp.pad(batch.astype(jnp.float32), (0, pad)).reshape(1, n_pad),
        jnp.pad(local_or_ghost.astype(jnp.float32), (0, pad)).reshape(1, n_pad),
    ], axis=0)                                                                  # (6, N_pad)

    node_spec = pl.BlockSpec((6, tile_n), lambda i: (0, i))
    slab_spec = pl.BlockSpec((4, tile_n), lambda i: (0, i))
    gsum_spec = pl.BlockSpec((num_graphs, 128), lambda i: (0, i))
    full_spec = lambda shape: pl.BlockSpec(shape, lambda i: (0, 0))

    weight_bytes = 4 * (w_hp.size + w_hz.size + b_aug.size + w_out_row.size
                        + w_ps.size + c.size)
    cost = pl.CostEstimate(
        flops=int(2 * n_pad * (hidden + 1) * (3 + n_species)
                  + 2 * n_pad * hidden * 4
                  + 10 * n_pad * hidden),
        transcendentals=int(n_pad * hidden),
        bytes_accessed=int(4 * (node_slab.size + 4 * n_pad
                                + num_graphs * num_tiles * 128)
                           + weight_bytes),
    )

    # rough per-step VMEM footprint (I/O double-buffered + live intermediates)
    live_rows = 6 + n_species + 3 * (hidden + 1) + 2 * hidden + 8 + 2 * num_graphs
    est_bytes = 4 * tile_n * (live_rows + 2 * (6 + 4)) + weight_bytes + (1 << 20)
    vmem_limit = int(min(50 * 1024 * 1024, max(32 * 1024 * 1024, 2 * est_bytes)))

    slab, gsum = pl.pallas_call(
        lammps_bam_kernel,
        out_shape=(jax.ShapeDtypeStruct((4, n_pad), jnp.float32),
                   jax.ShapeDtypeStruct((num_graphs, num_tiles * 128), jnp.float32)),
        grid=(num_tiles,),
        in_specs=[node_spec,                               # packed node slab
                  full_spec((hidden + 1, 3)),              # pos -> hidden (+E0 row)
                  full_spec((hidden + 1, n_species)),      # onehot -> hidden (+E0 row)
                  full_spec((hidden + 1, 1)),              # bias
                  full_spec((1, hidden)),                  # head-selected readout
                  full_spec((3, hidden)),                  # w_pos * w_out (forces)
                  full_spec((3, 1))],                      # force bias c
        out_specs=(slab_spec, gsum_spec),
        compiler_params=pltpu.CompilerParams(
            dimension_semantics=("parallel",),
            vmem_limit_bytes=vmem_limit),
        cost_estimate=cost,
    )(node_slab, w_hp, w_hz, b_aug, w_out_row, w_ps, c)

    node_energy = slab[0, :n_nodes]                        # (N,)
    forces = slab[1:4, :n_nodes].T                         # (N, 3)
    # per-tile per-graph partial sums (value broadcast across each 128-lane
    # column); pick lane 0 of every tile and sum -> (G,)
    total_energy_local = gsum.reshape(num_graphs, num_tiles, 128)[:, :, 0].sum(axis=1)

    return {
        'total_energy_local': total_energy_local,
        'node_energy': node_energy,
        'forces': forces,
        'virials': jnp.zeros((1, 3, 3), dtype=jnp.float32),
    }


def _reference_forward(params, data, local_or_ghost):
    """Pure-JAX reference (forces via jax.grad) to validate the kernel."""
    pos = data['positions'].astype(jnp.float32)
    species = data['node_species'].astype(jnp.int32)
    batch = data['batch'].astype(jnp.int32)
    num_graphs = int(data['ptr'].shape[0]) - 1
    n_species = params['w_emb'].shape[0]
    onehot = jax.nn.one_hot(species, n_species, dtype=jnp.float32)
    head_idx = int(params['head'])
    w_out = params['w_readout'][:, head_idx][None, :]

    def node_energy_fn(p):
        z = p @ params['w_pos'] + onehot @ params['w_emb'] + params['b']
        a = jnp.tanh(z)
        return (onehot @ params['atomic_energies'])[:, 0] + jnp.sum(a * w_out, axis=-1)

    node_e = node_energy_fn(pos)
    forces = -jax.grad(lambda p: node_energy_fn(p).sum())(pos)
    node_e_local = node_e * local_or_ghost.astype(jnp.float32)
    tot = jax.ops.segment_sum(node_e_local, batch, num_segments=num_graphs)
    return node_e, forces, tot


if __name__ == "__main__":
    key = jax.random.PRNGKey(0)
    N, Z, H, G, NUM_HEADS = 16, 8, 32, 2, 2

    ks = jax.random.split(key, 8)
    params = {
        # buffers of LAMMPS_BAM (atomic_numbers / r_max / num_interactions / head)
        'atomic_numbers': jnp.array([1, 6, 7, 8, 14, 16, 26, 29], dtype=jnp.int32),
        'r_max': jnp.float32(5.0),
        'num_interactions': jnp.int32(2),
        'head': NUM_HEADS - 1,                     # model.heads[-1]
        # synthetic model parameters (deterministic init)
        'w_pos': jax.random.normal(ks[0], (3, H), jnp.float32) * 0.5,
        'w_emb': jax.random.normal(ks[1], (Z, H), jnp.float32) * 0.5,
        'b': jax.random.normal(ks[2], (1, H), jnp.float32) * 0.1,
        'w_readout': jax.random.normal(ks[3], (H, NUM_HEADS), jnp.float32) * 0.3,
        'atomic_energies': jax.random.normal(ks[4], (Z, 1), jnp.float32),
    }

    data = {
        'positions': jax.random.normal(ks[5], (N, 3), jnp.float32) * 2.0,
        'node_species': jax.random.randint(ks[6], (N,), 0, Z, jnp.int32),
        'batch': jnp.concatenate([jnp.zeros(N // 2, jnp.int32),
                                  jnp.ones(N - N // 2, jnp.int32)]),
        'ptr': jnp.array([0, N // 2, N], dtype=jnp.int32),
    }
    # TODO(synk): neighbor-list / edge_index based message passing of the real BAM
    # model is not reproduced; the surrogate acts on node positions directly.
    local_or_ghost = (jax.random.uniform(ks[7], (N,)) > 0.25).astype(jnp.float32)

    out = lammps_bam_forward(params, data, local_or_ghost)
    jax.block_until_ready(out)

    ref_node_e, ref_forces, ref_tot = _reference_forward(params, data, local_or_ghost)
    np.testing.assert_allclose(np.asarray(out['node_energy']), np.asarray(ref_node_e),
                               rtol=1e-5, atol=1e-5)
    np.testing.assert_allclose(np.asarray(out['forces']), np.asarray(ref_forces),
                               rtol=1e-5, atol=1e-5)
    np.testing.assert_allclose(np.asarray(out['total_energy_local']), np.asarray(ref_tot),
                               rtol=1e-5, atol=1e-5)
    assert out['virials'].shape == (1, 3, 3)

    print("KERNEL_OK")
</pallas_src>

<mosaic_0001>
module attributes {stable_mosaic.version = 11 : i64} {
  func.func @lammps_bam_kernel(%arg0: i32, %arg1: memref<6x128xf32, #tpu.memory_space<vmem>>, %arg2: memref<33x3xf32, #tpu.memory_space<vmem>>, %arg3: memref<33x8xf32, #tpu.memory_space<vmem>>, %arg4: memref<33x1xf32, #tpu.memory_space<vmem>>, %arg5: memref<1x32xf32, #tpu.memory_space<vmem>>, %arg6: memref<3x32xf32, #tpu.memory_space<vmem>>, %arg7: memref<3x1xf32, #tpu.memory_space<vmem>>, %arg8: memref<4x128xf32, #tpu.memory_space<vmem>>, %arg9: memref<2x128xf32, #tpu.memory_space<vmem>>) attributes {dimension_semantics = [#tpu.dimension_semantics<parallel>], iteration_bounds = array<i64: 1>, scalar_prefetch = 0 : i64, scratch_operands = 0 : i64, tpu.core_type = #tpu.core_type<tc>, window_params = [{transform_indices = @transform_0, window_bounds = array<i64: 6, 128>}, {pipeline_mode = #tpu.pipeline_mode<synchronous>, transform_indices = @transform_1, window_bounds = array<i64: 33, 3>}, {pipeline_mode = #tpu.pipeline_mode<synchronous>, transform_indices = @transform_2, window_bounds = array<i64: 33, 8>}, {pipeline_mode = #tpu.pipeline_mode<synchronous>, transform_indices = @transform_3, window_bounds = array<i64: 33, 1>}, {pipeline_mode = #tpu.pipeline_mode<synchronous>, transform_indices = @transform_4, window_bounds = array<i64: 1, 32>}, {pipeline_mode = #tpu.pipeline_mode<synchronous>, transform_indices = @transform_5, window_bounds = array<i64: 3, 32>}, {pipeline_mode = #tpu.pipeline_mode<synchronous>, transform_indices = @transform_6, window_bounds = array<i64: 3, 1>}, {transform_indices = @transform_7, window_bounds = array<i64: 4, 128>}, {transform_indices = @transform_8, window_bounds = array<i64: 2, 128>}]} {
    %c0 = arith.constant 0 : index
    %c0_0 = arith.constant 0 : index
    %0 = vector.load %arg1[%c0, %c0_0] : memref<6x128xf32, #tpu.memory_space<vmem>>, vector<6x128xf32>
    %1 = vector.extract_strided_slice %0 {offsets = [0, 0], sizes = [3, 128], strides = [1, 1]} : vector<6x128xf32> to vector<3x128xf32>
    %2 = vector.extract_strided_slice %0 {offsets = [3, 0], sizes = [1, 128], strides = [1, 1]} : vector<6x128xf32> to vector<1x128xf32>
    %3 = arith.fptosi %2 : vector<1x128xf32> to vector<1x128xi32>
    %4 = vector.extract_strided_slice %0 {offsets = [4, 0], sizes = [1, 128], strides = [1, 1]} : vector<6x128xf32> to vector<1x128xf32>
    %5 = arith.fptosi %4 : vector<1x128xf32> to vector<1x128xi32>
    %6 = vector.extract_strided_slice %0 {offsets = [5, 0], sizes = [1, 128], strides = [1, 1]} : vector<6x128xf32> to vector<1x128xf32>
    %7 = tpu.iota {dimensions = array<i32: 0>} : vector<8x128xi32>
    %8 = vector.broadcast %3 : vector<1x128xi32> to vector<8x128xi32>
    %9 = arith.cmpi eq, %7, %8 : vector<8x128xi32>
    %10 = arith.extui %9 : vector<8x128xi1> to vector<8x128xi32>
    %11 = arith.sitofp %10 : vector<8x128xi32> to vector<8x128xf32>
    %c0_1 = arith.constant 0 : index
    %c0_2 = arith.constant 0 : index
    %12 = vector.load %arg2[%c0_1, %c0_2] : memref<33x3xf32, #tpu.memory_space<vmem>>, vector<33x3xf32>
    %cst = arith.constant dense<0.000000e+00> : vector<33x128xf32>
    %13 = tpu.matmul %12, %1, %cst {dimension_numbers = #tpu.dot_dimension_numbers<[1], [0], [0], [1], [0, 0, 1, 1], [], []>} : vector<33x3xf32>, vector<3x128xf32>, vector<33x128xf32> -> vector<33x128xf32>
    %c0_3 = arith.constant 0 : index
    %c0_4 = arith.constant 0 : index
    %14 = vector.load %arg3[%c0_3, %c0_4] : memref<33x8xf32, #tpu.memory_space<vmem>>, vector<33x8xf32>
    %cst_5 = arith.constant dense<0.000000e+00> : vector<33x128xf32>
    %15 = tpu.matmul %14, %11, %cst_5 {dimension_numbers = #tpu.dot_dimension_numbers<[1], [0], [0], [1], [0, 0, 1, 1], [], []>} : vector<33x8xf32>, vector<8x128xf32>, vector<33x128xf32> -> vector<33x128xf32>
    %16 = arith.addf %13, %15 : vector<33x128xf32>
    %c0_6 = arith.constant 0 : index
    %c0_7 = arith.constant 0 : index
    %17 = vector.load %arg4[%c0_6, %c0_7] : memref<33x1xf32, #tpu.memory_space<vmem>>, vector<33x1xf32>
    %18 = vector.broadcast %17 : vector<33x1xf32> to vector<33x128xf32>
    %19 = arith.addf %16, %18 : vector<33x128xf32>
    %20 = vector.extract_strided_slice %19 {offsets = [0, 0], sizes = [32, 128], strides = [1, 1]} : vector<33x128xf32> to vector<32x128xf32>
    %21 = math.tanh %20 : vector<32x128xf32>
    %22 = vector.extract_strided_slice %19 {offsets = [32, 0], sizes = [1, 128], strides = [1, 1]} : vector<33x128xf32> to vector<1x128xf32>
    %c0_8 = arith.constant 0 : index
    %c0_9 = arith.constant 0 : index
    %23 = vector.load %arg5[%c0_8, %c0_9] : memref<1x32xf32, #tpu.memory_space<vmem>>, vector<1x32xf32>
    %cst_10 = arith.constant dense<0.000000e+00> : vector<1x128xf32>
    %24 = tpu.matmul %23, %21, %cst_10 {dimension_numbers = #tpu.dot_dimension_numbers<[1], [0], [0], [1], [0, 0, 1, 1], [], []>} : vector<1x32xf32>, vector<32x128xf32>, vector<1x128xf32> -> vector<1x128xf32>
    %25 = arith.addf %22, %24 : vector<1x128xf32>
    %c0_11 = arith.constant 0 : index
    %c0_12 = arith.constant 0 : index
    %26 = vector.load %arg8[%c0_11, %c0_12] : memref<4x128xf32, #tpu.memory_space<vmem>>, vector<1x128xf32>
    tpu.vector_store %arg8[%c0_11, %c0_12], %25 {strides = array<i32>} : memref<4x128xf32, #tpu.memory_space<vmem>>, vector<1x128xf32>,
    %c0_13 = arith.constant 0 : index
    %c0_14 = arith.constant 0 : index
    %27 = vector.load %arg7[%c0_13, %c0_14] : memref<3x1xf32, #tpu.memory_space<vmem>>, vector<3x1xf32>
    %c0_15 = arith.constant 0 : index
    %c0_16 = arith.constant 0 : index
    %28 = vector.load %arg6[%c0_15, %c0_16] : memref<3x32xf32, #tpu.memory_space<vmem>>, vector<3x32xf32>
    %29 = arith.mulf %21, %21 : vector<32x128xf32>
    %cst_17 = arith.constant dense<0.000000e+00> : vector<3x128xf32>
    %30 = tpu.matmul %28, %29, %cst_17 {dimension_numbers = #tpu.dot_dimension_numbers<[1], [0], [0], [1], [0, 0, 1, 1], [], []>} : vector<3x32xf32>, vector<32x128xf32>, vector<3x128xf32> -> vector<3x128xf32>
    %31 = vector.broadcast %27 : vector<3x1xf32> to vector<3x128xf32>
    %32 = arith.addf %31, %30 : vector<3x128xf32>
    %c1 = arith.constant 1 : index
    %c0_18 = arith.constant 0 : index
    %33 = vector.load %arg8[%c1, %c0_18] : memref<4x128xf32, #tpu.memory_space<vmem>>, vector<3x128xf32>
    tpu.vector_store %arg8[%c1, %c0_18], %32 {strides = array<i32>} : memref<4x128xf32, #tpu.memory_space<vmem>>, vector<3x128xf32>,
    %34 = tpu.iota {dimensions = array<i32: 0>} : vector<2x128xi32>
    %35 = vector.broadcast %5 : vector<1x128xi32> to vector<2x128xi32>
    %36 = arith.cmpi eq, %34, %35 : vector<2x128xi32>
    %37 = arith.extui %36 : vector<2x128xi1> to vector<2x128xi32>
    %38 = arith.sitofp %37 : vector<2x128xi32> to vector<2x128xf32>
    %39 = arith.mulf %25, %6 : vector<1x128xf32>
    %40 = vector.broadcast %39 : vector<1x128xf32> to vector<2x128xf32>
    %41 = arith.mulf %38, %40 : vector<2x128xf32>
    %cst_19 = arith.constant dense<0.000000e+00> : vector<2xf32>
    %42 = vector.multi_reduction <add>, %41, %cst_19 [1] : vector<2x128xf32> to vector<2xf32>
    %43 = vector.shape_cast %42 : vector<2xf32> to vector<2x1xf32>
    %44 = vector.shape_cast %43 : vector<2x1xf32> to vector<2x1xf32>
    %45 = vector.broadcast %44 : vector<2x1xf32> to vector<2x128xf32>
    %c0_20 = arith.constant 0 : index
    %c0_21 = arith.constant 0 : index
    %46 = vector.load %arg9[%c0_20, %c0_21] : memref<2x128xf32, #tpu.memory_space<vmem>>, vector<2x128xf32>
    tpu.vector_store %arg9[%c0_20, %c0_21], %45 {strides = array<i32>} : memref<2x128xf32, #tpu.memory_space<vmem>>, vector<2x128xf32>,
    return
  }
  func.func @transform_0(%arg0: i32) -> (i32, i32) {
    %c0_i32 = arith.constant 0 : i32
    %c0_i32_0 = arith.constant 0 : i32
    return %c0_i32, %arg0 : i32, i32
  }
  func.func @transform_1(%arg0: i32) -> (i32, i32) {
    %c0_i32 = arith.constant 0 : i32
    %c0_i32_0 = arith.constant 0 : i32
    %c0_i32_1 = arith.constant 0 : i32
    return %c0_i32, %c0_i32_0 : i32, i32
  }
  func.func @transform_2(%arg0: i32) -> (i32, i32) {
    %c0_i32 = arith.constant 0 : i32
    %c0_i32_0 = arith.constant 0 : i32
    %c0_i32_1 = arith.constant 0 : i32
    return %c0_i32, %c0_i32_0 : i32, i32
  }
  func.func @transform_3(%arg0: i32) -> (i32, i32) {
    %c0_i32 = arith.constant 0 : i32
    %c0_i32_0 = arith.constant 0 : i32
    %c0_i32_1 = arith.constant 0 : i32
    return %c0_i32, %c0_i32_0 : i32, i32
  }
  func.func @transform_4(%arg0: i32) -> (i32, i32) {
    %c0_i32 = arith.constant 0 : i32
    %c0_i32_0 = arith.constant 0 : i32
    %c0_i32_1 = arith.constant 0 : i32
    return %c0_i32, %c0_i32_0 : i32, i32
  }
  func.func @transform_5(%arg0: i32) -> (i32, i32) {
    %c0_i32 = arith.constant 0 : i32
    %c0_i32_0 = arith.constant 0 : i32
    %c0_i32_1 = arith.constant 0 : i32
    return %c0_i32, %c0_i32_0 : i32, i32
  }
  func.func @transform_6(%arg0: i32) -> (i32, i32) {
    %c0_i32 = arith.constant 0 : i32
    %c0_i32_0 = arith.constant 0 : i32
    %c0_i32_1 = arith.constant 0 : i32
    return %c0_i32, %c0_i32_0 : i32, i32
  }
  func.func @transform_7(%arg0: i32) -> (i32, i32) {
    %c0_i32 = arith.constant 0 : i32
    %c0_i32_0 = arith.constant 0 : i32
    return %c0_i32, %arg0 : i32, i32
  }
  func.func @transform_8(%arg0: i32) -> (i32, i32) {
    %c0_i32 = arith.constant 0 : i32
    %c0_i32_0 = arith.constant 0 : i32
    return %c0_i32, %arg0 : i32, i32
  }
}

</mosaic_0001>

<bundles_post_ra>
// kernel: tpu_custom_call.1
= control target key start
LH: loop header
LB: loop body
LE: loop exit
PB: predicated region body
PF: predicated region fallthrough
CT: control target
= control target key end

     0   :  { %14 = vsyncpa [#allocation3], 0  ;;  %vm173_vm0 = vcmask 1042432   ;;  %v32_v2 = vlaneseq  ;;  %v673_v3 = vmov 0.0   ;;  %vm674_vm1 = vmmov 0   ;;  %s848_s0 = inlined_call_operand.vmem [shape: f32[6,128], index: 0, kind: input, shape index: {}]   ;;  %s849_s1 = inlined_call_operand.vmem [shape: f32[33,3], index: 1, kind: input, shape index: {}]   ;;  %s850_s2 = inlined_call_operand.vmem [shape: f32[33,8], index: 2, kind: input, shape index: {}]   ;;  %s851_s3 = inlined_call_operand.vmem [shape: f32[33,1], index: 3, kind: input, shape index: {}]   ;;  %s852_s4 = inlined_call_operand.vmem [shape: f32[1,32], index: 4, kind: input, shape index: {}]   ;;  %s853_s5 = inlined_call_operand.vmem [shape: f32[3,32], index: 5, kind: input, shape index: {}]   ;;  %s854_s6 = inlined_call_operand.vmem [shape: f32[3,1], index: 6, kind: input, shape index: {}]   ;;  %s855_s7 = inlined_call_operand.hbm [shape: f32[4,128], index: 7, kind: output, shape index: {0}]   ;;  %s856_s8 = inlined_call_operand.hbm [shape: f32[2,128], index: 8, kind: output, shape index: {1}]  }
   0x1   :  { %v727_v0 = vld [vmem:[%s848_s0] sm:$0x3f]  ;;  %572 = vmatprep.subr.mxu1 %v673_v3  ;;  %574 = vmatprep.mubr.msk.f32.mxu1 %vm674_vm1, %v673_v3  ;;  %vm157_vm2 = vcmask 23552   ;;  %v42_v8 = vld [vmem:[%s849_s1 + $0x8] sm:$0xff]  ;;  %v675_v9 = vmov 0   ;;  %v270_v11 = vld [vmem:[%s851_s3 + $0x18] sm:$0xff] }
   0x2   :  { %v41_v1 = vld [vmem:[%s849_s1] sm:$0xff]  ;;  %v611_v4 = vtrunc.f32 %v727_v0  ;;  %573 = vmatpush3.msk.msra.mxu1 %vm173_vm0, %v727_v0  ;;  %555 = vmatprep.subr.mxu0 %v673_v3  ;;  %v738_v5 = vshrl.u32 %v32_v2, 7  ;;  %v268_v10 = vld [vmem:[%s851_s3 + $0x8] sm:$0xff] }
   0x3   :  { %575 = vmatmul.mubr.msk.f32.vlgmr.msra.gmra.mxu1 %vm157_vm2, %v41_v1  ;;  %557 = vmatprep.mubr.msk.f32.mxu0 %vm674_vm1, %v673_v3  ;;  %v267_v13 = vld [vmem:[%s851_s3] sm:$0xff] }
   0x4   :  { %v740_v6 = vcvt.f32.s32 %v611_v4  ;;  %v36_v7 = vsub.s32 3, %v738_v5  ;;  %577 = vmatprep.mubr.msk.f32.mxu1 %vm674_vm1, %v673_v3  ;;  %620 = vset.pattern.permute.xlu1 %v675_v9 }
   0x5   :  { %279 = vperm.xlu1 %620, %v268_v10   ;;  %619 = vset.pattern.permute.xlu0 %v675_v9 }
   0x6   :  { %v37_v12 = vrot.slane %v740_v6, %v36_v7  ;;  %289 = vperm.xlu0 %619, %v270_v11   ;;  %600 = vmatprep.subr.mxu1 %v673_v3 }
   0x7   :  { %15 = vsyncpa [#allocation5], 0  ;;  %v46_v14 = vld [vmem:[%s850_s2] sm:$0xff]  ;;  %vm51_vm3 = vcmask 64512   ;;  %578 = vmatmul.mubr.msk.f32.gmra.mxu1 %vm157_vm2, %v42_v8  ;;  %v269_v15 = vld [vmem:[%s851_s3 + $0x10] sm:$0xff]  ;;  %v676_v17 = vmov 1.0  }
   0x8   :  { %vm38_vm4 = vcmp.eq.s32.totalorder %v738_v5, %v37_v12  ;;  %580 = vmatprep.mubr.msk.f32.mxu1 %vm674_vm1, %v673_v3  ;;  %v43_v16 = vld [vmem:[%s849_s1 + $0x10] sm:$0xff]  ;;  %v47_v18 = vld [vmem:[%s850_s2 + $0x8] sm:$0xff]  ;;  %v271_v19 = vld [vmem:[%s851_s3 + $0x20] sm:$0x1]  ;;  %vm307_vm5 = vcmask 261120   ;;  %v471_v9 = vsub.s32 4, %v738_v5 }
   0x9   :  { %556 = vmatpush3.msk.msra.mxu0 %vm38_vm4, %v676_v17  ;;  %274 = vperm.xlu1 %620, %v267_v13   ;;  %v44_v20 = vld [vmem:[%s849_s1 + $0x18] sm:$0xff]  ;;  %v48_v21 = vld [vmem:[%s850_s2 + $0x10] sm:$0xff]  ;;  %v383_v22 = vld [vmem:[%s854_s6] sm:$0x7]  ;;  %v476_v12 = vrot.slane %v727_v0, 5  ;;  %v481_v17 = vsub.s32 0, %v738_v5 }
   0xa   :  { %558 = vmatmul.mubr.msk.f32.vlgmr.msra.gmra.mxu0 %vm51_vm3, %v46_v14  ;;  %284 = vperm.xlu0 %619, %v269_v15   ;;  %v45_v23 = vld [vmem:[%s849_s1 + $0x20] sm:$0x1]  ;;  %v49_v24 = vld [vmem:[%s850_s2 + $0x18] sm:$0xff]  ;;  %v472_v11 = vrot.slane %v740_v6, %v471_v9  ;;  %vm484_vm7 = vcmask 1041408  }
   0xb   :  { %560 = vmatprep.mubr.msk.f32.mxu0 %vm674_vm1, %v673_v3  ;;  %581 = vmatmul.mubr.msk.f32.gmra.mxu1 %vm157_vm2, %v43_v16  ;;  %v50_v25 = vld [vmem:[%s850_s2 + $0x20] sm:$0x1] }
   0xc   :  { %583 = vmatprep.mubr.msk.f32.mxu1 %vm674_vm1, %v673_v3  ;;  %589 = vmatprep.subr.mxu0 %v673_v3  ;;  %v306_v4 = vld [vmem:[%s852_s4] sm:$0x1]  ;;  %vm473_vm6 = vcmp.eq.s32.totalorder %v738_v5, %v472_v11  ;;  %s677_s4 = smov [#allocation2]  }
   0xd   :  { %v384_v8 = vld [vmem:[%s853_s5] sm:$0x7]  ;;  %s495_s5 = sshll.u32 %s677_s4, 4  ;;  %s496_s5 = int_to_ptr.vmem [resolvable:$true] %s495_s5 }
   0xe   :  { %561 = vmatmul.mubr.msk.f32.gmra.mxu0 %vm51_vm3, %v47_v18  ;;  %294 = vperm.xlu0 %619, %v271_v19   ;;  %s629_s15 = scalar_lea.vmem %s496_s5, 64  ;;  %p634_p1 = scmp.lt.s32.totalorder %s496_s5, %s496_s5 }
   0xf   :  { %563 = vmatprep.mubr.msk.f32.mxu0 %vm674_vm1, %v673_v3  ;;  %584 = vmatmul.mubr.msk.f32.gmra.mxu1 %vm157_vm2, %v44_v20  ;;  %p630_p0 = scmp.ne.s32.totalorder %s496_s5, %s629_s15  ;;  %p635_p2 = scmp.lt.s32.totalorder %s629_s15, %s629_s15 }
  0x10   :  { %586 = vmatprep.mubr.msk.f32.mxu1 %vm674_vm1, %v673_v3 }
  0x11   :  { %p636_p3 = por %p635_p2, %p634_p1 }
  0x12   :  { %564 = vmatmul.mubr.msk.f32.gmra.mxu0 %vm51_vm3, %v48_v21  ;;  %464 = vperm.xlu0 %619, %v383_v22   ;;  %v532_v22 = vsel %vm473_vm6, 1.0, %v673_v3 }
  0x13   :  { %566 = vmatprep.mubr.msk.f32.mxu0 %vm674_vm1, %v673_v3  ;;  %587 = vmatmul.mubr.msk.f32.gmra.mxu1 %vm157_vm2, %v45_v23  ;;  %p637_p4 = pnand %p636_p3, %p630_p0 }
  0x14   :  { %608 = vmatprep.mubr.msk.f32.mxu1 %vm674_vm1, %v673_v3 }
  0x16   :  { %567 = vmatmul.mubr.msk.f32.gmra.mxu0 %vm51_vm3, %v49_v24 }
  0x17   :  { %569 = vmatprep.mubr.msk.f32.mxu0 %vm674_vm1, %v673_v3 }
  0x1a   :  { %570 = vmatmul.mubr.msk.f32.gmra.mxu0 %vm51_vm3, %v50_v25 }
  0x1b   :  { %597 = vmatprep.mubr.msk.f32.mxu0 %vm674_vm1, %v673_v3 }
  0x80   :  { %v280_v39 = vpop.permute.xlu1 %279 }
  0x81   :  { %v290_v35 = vpop.permute.xlu0 %289 }
  0x84   :  { %v275_v51 = vpop.permute.xlu1 %274 }
  0x85   :  { %v285_v45 = vpop.permute.xlu0 %284 }
  0x89   :  { %v295_v10 = vpop.permute.xlu0 %294 }
  0x8d   :  { %v465_v15 = vpop.permute.xlu0 %464 }
  0xc3   :  { %v243_v26 = vpop.f32.mrf.mxu1 }
  0xc5   :  { %v576_v27 = vpop.f32.mrf.mxu1 }
  0xc7   :  { %v248_v28 = vpop.f32.mrf.mxu1 }
  0xc9   :  { %v579_v29 = vpop.f32.mrf.mxu1 }
  0xca   :  { %v133_v30 = vpop.f32.mrf.mxu0 }
  0xcb   :  { %v253_v31 = vpop.f32.mrf.mxu1  ;;  %v244_v49 = vadd.f32 %v243_v26, %v133_v30 }
  0xcc   :  { %v559_v32 = vpop.f32.mrf.mxu0 }
  0xcd   :  { %v582_v33 = vpop.f32.mrf.mxu1  ;;  %v297_v56 = vadd.f32 %v275_v51, %v244_v49 }
  0xce   :  { %v138_v34 = vpop.f32.mrf.mxu0 }
  0xcf   :  { %v258_v36 = vpop.f32.mrf.mxu1  ;;  %v249_v44 = vadd.f32 %v248_v28, %v138_v34 }
  0xd0   :  { %v562_v37 = vpop.f32.mrf.mxu0 }
  0xd1   :  { %v585_v38 = vpop.f32.mrf.mxu1  ;;  %v298_v53 = vadd.f32 %v280_v39, %v249_v44 }
  0xd2   :  { %v143_v40 = vpop.f32.mrf.mxu0 }
  0xd3   :  { %v254_v41 = vadd.f32 %v253_v31, %v143_v40  ;;  %v263_v42 = vpop.f32.mrf.mxu1 }
  0xd4   :  { %v565_v43 = vpop.f32.mrf.mxu0 }
  0xd5   :  { %v588_v46 = vpop.f32.mrf.mxu1  ;;  %v299_v47 = vadd.f32 %v285_v45, %v254_v41 }
  0xd6   :  { %v148_v48 = vpop.f32.mrf.mxu0 }
  0xd7   :  { %v259_v50 = vadd.f32 %v258_v36, %v148_v48  ;;  %621 = vtanh.f32 %v299_v47 }
  0xd8   :  { %v568_v52 = vpop.f32.mrf.mxu0 }
  0xd9   :  { %v300_v54 = vadd.f32 %v290_v35, %v259_v50 }
  0xda   :  { %v153_v55 = vpop.f32.mrf.mxu0 }
  0xdb   :  { %623 = vtanh.f32 %v300_v54  ;;  %v264_v57 = vadd.f32 %v263_v42, %v153_v55 }
  0xdc   :  { %v571_v58 = vpop.f32.mrf.mxu0  ;;  %625 = vtanh.f32 %v298_v53 }
  0xdd   :  { %627 = vtanh.f32 %v297_v56  ;;  %v301_v13 = vadd.f32 %v295_v10, %v264_v57 }
  0xe4   :  { %v622_v59 = vpop.eup %621 }
  0xe5   :  { %v387_v63 = vmul.f32 %v622_v59, %v622_v59 }
  0xe8   :  { %v624_v60 = vpop.eup %623 }
  0xe9   :  { %590 = vmatpush3.msra.mxu0 %v624_v60  ;;  %v388_v61 = vmul.f32 %v624_v60, %v624_v60  ;;  %v626_v62 = vpop.eup %625 }
  0xea   :  { %591 = vmatprep.subr.mxu0 %v673_v3  ;;  %v628_v1 = vpop.eup %627  ;;  %v386_v2 = vmul.f32 %v626_v62, %v626_v62 }
  0xeb   :  { %592 = vmatpush3.msra.mxu0 %v622_v59  ;;  %601 = vmatpush3.msra.mxu1 %v388_v61  ;;  %v385_v7 = vmul.f32 %v628_v1, %v628_v1 }
  0xec   :  { %593 = vmatprep.subr.mxu0 %v673_v3  ;;  %602 = vmatprep.subr.mxu1 %v673_v3 }
  0xed   :  { %594 = vmatpush3.msra.mxu0 %v626_v62  ;;  %603 = vmatpush3.msra.mxu1 %v387_v63 }
  0xee   :  { %595 = vmatprep.subr.mxu0 %v673_v3  ;;  %604 = vmatprep.subr.mxu1 %v673_v3 }
  0xef   :  { %596 = vmatpush3.msra.mxu0 %v628_v1  ;;  %605 = vmatpush3.msra.mxu1 %v386_v2 }
  0xf0   :  { %598 = vmatmul.mubr.msk.f32.vlgmr.msra.gmra.mxu0 %vm307_vm5, %v306_v4  ;;  %606 = vmatprep.subr.mxu1 %v673_v3 }
  0xf1   :  { %607 = vmatpush3.msra.mxu1 %v385_v7 }
  0xf2   :  { %609 = vmatmul.mubr.msk.f32.vlgmr.msra.gmra.mxu1 %vm307_vm5, %v384_v8 }
 0x1b0   :  { %v377_v14 = vpop.f32.mrf.mxu0 }
 0x1b1   :  { %v381_v16 = vadd.f32 %v377_v14, %v301_v13 }
 0x1b2   :  { %v458_v18 = vpop.f32.mrf.mxu1  ;;  %v599_v19 = vpop.f32.mrf.mxu0 }
 0x1b3   :  { %v478_v20 = vmul.f32 %v476_v12, %v381_v16  ;;  %382 = vst [vmem:[#allocation2] sm:$0x1] %v381_v16  ;;  %v467_v21 = vadd.f32 %v465_v15, %v458_v18 }
 0x1b4   :  { %v610_v23 = vpop.f32.mrf.mxu1 }
 0x1b5   :  { %468 = vst [vmem:[#allocation2 + $0x1] sm:$0x7] %v467_v21  ;;  %v482_v6 = vrot.slane %v478_v20, %v481_v17 }
 0x1b7   :  { %v483_v0 = vmul.f32 %v532_v22, %v482_v6 }
 0x1b9   :  { %v485_v24 = vsel %vm484_vm7, %v483_v0, 0.0 }
 0x1ba   :  { %486 = vadd.xlane.f32.xlu1 %v485_v24 }
 0x1bb   :  { %640 = shalt.err (!%p637_p4)
}
 0x1bc   :  { %498 = dma.vmem_to_hbm [thread:$0]  %s496_s5, 64, %s855_s7, [#allocation3]  }
 0x1bd   :  { %s678_s18 = smov [#allocation4]  }
 0x1be   :  { %s505_s19 = sshll.u32 %s678_s18, 4  ;;  %s506_s19 = int_to_ptr.vmem [resolvable:$true] %s505_s19 }
 0x1bf   :  { %s649_s20 = scalar_lea.vmem %s506_s19, 32  ;;  %p654_p6 = scmp.lt.s32.totalorder %s506_s19, %s506_s19 }
 0x1c0   :  { %p650_p5 = scmp.ne.s32.totalorder %s506_s19, %s649_s20  ;;  %p655_p7 = scmp.lt.s32.totalorder %s649_s20, %s649_s20 }
 0x1c2   :  { %p656_p8 = por %p655_p7, %p654_p6 }
 0x1c4   :  { %p657_p9 = pnand %p656_p8, %p650_p5 }
 0x243   :  { %v487_v3 = vpop.xlane.xlu1 %486 }
 0x244   :  { %488 = vst [vmem:[#allocation4] sm:$0x3] %v487_v3 }
 0x245   :  { %660 = shalt.err (!%p657_p9)
}
 0x246   :  { %508 = dma.vmem_to_hbm [thread:$0]  %s506_s19, 32, %s856_s8, [#allocation5]  }
 0x247   :  { %669 = dma.done.wait [#allocation3], 64  }
 0x248   :  { %670 = vsyncadd [#allocation3], 4294967232 }
 0x249   :  { %671 = dma.done.wait [#allocation5], 32  }
 0x24a   :  { %672 = vsyncadd [#allocation5], 4294967264 }
 0x24b   :  { %515 = vsyncpa [#allocation3], 1 }
 0x24c   :  { %516 = vsyncpa [#allocation5], 1 }

</bundles_post_ra>
